<compile_context>
chip_gen: v7x
topology: tpu7x:2x2x1
jax: 0.10.0
libtpu: 0.0.40
codegen_flags: <defaults>
</compile_context>

<pallas_src>
import jax
import jax.numpy as jnp
from jax.experimental import pallas as pl
from jax.experimental.pallas import tpu as pltpu


# ----------------------------- Pallas kernel --------------------------------

def _attention_block_kernel(g_ref, x_ref, wg_ref, wx_ref, bgx_ref, wp_ref, bp_ref,
                            o_ref):
    """One (batch n, spatial tile j) block.

    g_ref  : (F_g, T)     gating-signal tile (bf16), T spatial positions on lanes
    x_ref  : (F_l, T)     skip-connection tile (bf16)
    wg_ref : (F_int, F_g) BN-folded 1x1 conv weight for W_g (bf16)
    wx_ref : (F_int, F_l) BN-folded 1x1 conv weight for W_x (bf16)
    bgx_ref: (F_int, 1)   fused bias  b_g + b_x (f32)
    wp_ref : (F_int, 1)   BN-folded psi weight as a column (f32)
    bp_ref : (1, 1)       BN-folded psi bias (f32)
    o_ref  : (F_l, T)     output tile (bf16) = x * psi, psi broadcast over channels
    """
    # s = BN(Conv1x1(g)) + BN(Conv1x1(x))   (BN folded; biases pre-summed).
    # Native bf16 MXU matmuls, f32 accumulation, lane-dense (F_int, T) results.
    s = (jnp.dot(wg_ref[...], g_ref[...], preferred_element_type=jnp.float32)
         + jnp.dot(wx_ref[...], x_ref[...], preferred_element_type=jnp.float32)
         + bgx_ref[...])

    # LeakyReLU (PyTorch nn.LeakyReLU default negative_slope = 0.01)
    s = jnp.where(s >= 0, s, 0.01 * s)

    # psi = Sigmoid(BN(Conv1x1(s))) with a single output channel:
    # VPU multiply + sublane reduction (the MXU would be underfilled for N=1).
    z = jnp.sum(s * wp_ref[...], axis=0, keepdims=True) + bp_ref[...]   # (1, T) f32
    psi = jax.nn.sigmoid(z).astype(o_ref.dtype)                          # (1, T) bf16

    # out = x * psi   (bf16 * bf16 -> bf16, psi broadcast across channel sublanes)
    o_ref[...] = x_ref[...] * psi


# ------------------------------ JAX wrapper ----------------------------------

def _round_up(a, b):
    return (a + b - 1) // b * b


def _fold_bn(w_oc_ic, b, gamma, beta, mean, var, eps=1e-5):
    """Fold an eval-mode BatchNorm into a 1x1 conv.

    w_oc_ic: (C_out, C_in)  PyTorch-style 1x1 conv weight (kernel dims squeezed)
    Returns (W, b) with W shaped (C_out, C_in) for the (C_out,C_in)@(C_in,T) matmul.
    """
    s = gamma / jnp.sqrt(var + eps)                     # (C_out,)
    w_eff = w_oc_ic * s[:, None]                        # (C_out, C_in)
    b_eff = (b - mean) * s + beta                       # (C_out,)
    return w_eff.astype(jnp.float32), b_eff.astype(jnp.float32)


def attention_block(g, x, params, *, tile_hw=2048):
    """g, x: NCHW arrays. Returns x * psi in NCHW (same dtype as x).

    Generation notes: tile_hw=2048 fits the 48 MiB VMEM budget on v5e/v6e/v7x
    even for F_l~512 with bf16 tiles; on v6e with small channel counts it can be
    raised to 4096+ for slightly better per-step overhead amortization.
    """
    N, F_g, H, W = g.shape
    _, F_l, _, _ = x.shape
    HW = H * W

    wg, bg = _fold_bn(params["wg"], params["bg"], *params["bn_g"])
    wx, bx = _fold_bn(params["wx"], params["bx"], *params["bn_x"])
    wp, bp = _fold_bn(params["wp"], params["bp"], *params["bn_p"])
    F_int = wg.shape[0]

    # bf16 weights -> native-bf16 MXU path; biases / psi weight stay f32.
    wg_b = wg.astype(jnp.bfloat16)
    wx_b = wx.astype(jnp.bfloat16)
    bgx = (bg + bx).reshape(F_int, 1)                   # fused bias (f32)
    wp_col = wp.reshape(1, F_int).T                     # (F_int, 1) column (f32)
    bp = bp.reshape(1, 1)

    # NCHW -> (N, C, HW): spatial on the lane axis, no transpose needed.
    # (Producers that already emit bf16 avoid this extra cast pass entirely.)
    g3 = g.reshape(N, F_g, HW)
    x3 = x.reshape(N, F_l, HW)
    if g3.dtype != jnp.bfloat16:
        g3 = g3.astype(jnp.bfloat16)
    if x3.dtype != jnp.bfloat16:
        x3 = x3.astype(jnp.bfloat16)

    # Pad only to a lane multiple of 128 (cheap); the boundary block of a
    # non-dividing grid is handled (masked) by the Pallas pipeline.
    HW_pad = _round_up(HW, 128)
    if HW_pad != HW:
        pad = HW_pad - HW
        g3 = jnp.pad(g3, ((0, 0), (0, 0), (0, pad)))
        x3 = jnp.pad(x3, ((0, 0), (0, 0), (0, pad)))

    tile = min(_round_up(tile_hw, 128), HW_pad)
    grid = (N, pl.cdiv(HW_pad, tile))

    full = lambda shape: pl.BlockSpec(shape, lambda n, j: (0, 0))

    cost = pl.CostEstimate(
        flops=2 * N * HW_pad * F_int * (F_g + F_l) + 4 * N * HW_pad * F_int,
        transcendentals=N * HW_pad,
        bytes_accessed=N * HW_pad * (F_g + 2 * F_l) * 2
        + (F_int * (F_g + F_l)) * 2 + (2 * F_int + 2) * 4,
    )

    out = pl.pallas_call(
        _attention_block_kernel,
        out_shape=jax.ShapeDtypeStruct((N, F_l, HW_pad), jnp.bfloat16),
        grid_spec=pltpu.PrefetchScalarGridSpec(
            num_scalar_prefetch=0,
            grid=grid,
            in_specs=[
                pl.BlockSpec((None, F_g, tile), lambda n, j: (n, 0, j)),  # g tile
                pl.BlockSpec((None, F_l, tile), lambda n, j: (n, 0, j)),  # x tile
                full((F_int, F_g)),        # W_g (bf16)
                full((F_int, F_l)),        # W_x (bf16)
                full((F_int, 1)),          # b_g + b_x (f32)
                full((F_int, 1)),          # W_psi column (f32)
                full((1, 1)),              # b_psi (f32)
            ],
            out_specs=pl.BlockSpec((None, F_l, tile), lambda n, j: (n, 0, j)),
        ),
        compiler_params=pltpu.CompilerParams(
            dimension_semantics=("parallel", "parallel"),
            vmem_limit_bytes=48 * 1024 * 1024),
        cost_estimate=cost,
    )(g3, x3, wg_b, wx_b, bgx, wp_col, bp)

    # (N, F_l, HW_pad) -> NCHW; slice only if we actually padded.
    if HW_pad != HW:
        out = out[:, :, :HW]
    return out.astype(x.dtype).reshape(N, F_l, H, W)


# --------------------------- Reference (plain JAX) ---------------------------

def attention_block_ref(g, x, params, gate_weight_dtype=jnp.float32):
    """Pure-JAX reference. `gate_weight_dtype=bf16` mimics the kernel's bf16
    folded W_g/W_x weights (psi weight stays f32, matching the kernel)."""
    wg, bg = _fold_bn(params["wg"], params["bg"], *params["bn_g"])
    wx, bx = _fold_bn(params["wx"], params["bx"], *params["bn_x"])
    wp, bp = _fold_bn(params["wp"], params["bp"], *params["bn_p"])
    wg = wg.astype(gate_weight_dtype).astype(jnp.float32)
    wx = wx.astype(gate_weight_dtype).astype(jnp.float32)
    g1 = jnp.einsum("oi,nihw->nohw", wg, g) + bg[None, :, None, None]
    x1 = jnp.einsum("oi,nihw->nohw", wx, x) + bx[None, :, None, None]
    s = g1 + x1
    s = jnp.where(s >= 0, s, 0.01 * s)
    z = jnp.einsum("oi,nihw->nohw", wp, s) + bp[None, :, None, None]
    psi = jax.nn.sigmoid(z)
    return x * psi


# --------------------------------- Main ---------------------------------------

def _make_params(key, F_g, F_l, F_int):
    ks = jax.random.split(key, 12)

    def bn(k, c):
        k1, k2, k3, k4 = jax.random.split(k, 4)
        gamma = 1.0 + 0.1 * jax.random.normal(k1, (c,), jnp.float32)
        beta = 0.1 * jax.random.normal(k2, (c,), jnp.float32)
        mean = 0.1 * jax.random.normal(k3, (c,), jnp.float32)
        var = jnp.abs(jax.random.normal(k4, (c,), jnp.float32)) + 0.5
        return (gamma, beta, mean, var)

    return {
        "wg": 0.3 * jax.random.normal(ks[0], (F_int, F_g), jnp.float32),
        "bg": 0.1 * jax.random.normal(ks[1], (F_int,), jnp.float32),
        "bn_g": bn(ks[2], F_int),
        "wx": 0.3 * jax.random.normal(ks[3], (F_int, F_l), jnp.float32),
        "bx": 0.1 * jax.random.normal(ks[4], (F_int,), jnp.float32),
        "bn_x": bn(ks[5], F_int),
        "wp": 0.3 * jax.random.normal(ks[6], (1, F_int), jnp.float32),
        "bp": 0.1 * jax.random.normal(ks[7], (1,), jnp.float32),
        "bn_p": bn(ks[8], 1),
    }


if __name__ == "__main__":
    key = jax.random.PRNGKey(0)
    k_g, k_x, k_p = jax.random.split(key, 3)

    N, F_g, F_l, F_int, H, W = 2, 4, 4, 8, 16, 16
    g = jax.random.normal(k_g, (N, F_g, H, W), jnp.float32)
    x = jax.random.normal(k_x, (N, F_l, H, W), jnp.float32)
    params = _make_params(k_p, F_g, F_l, F_int)

    out = attention_block(g, x, params)
    out = jax.block_until_ready(out)

    # Reference on the same bf16-quantized inputs / bf16 gate weights
    # (kernel uses bf16 I/O and bf16 folded W_g/W_x).
    g_q = g.astype(jnp.bfloat16).astype(jnp.float32)
    x_q = x.astype(jnp.bfloat16).astype(jnp.float32)
    ref = attention_block_ref(g_q, x_q, params, gate_weight_dtype=jnp.bfloat16)

    assert out.shape == (N, F_l, H, W)
    assert jnp.allclose(out.astype(jnp.float32), ref, atol=1e-2, rtol=2e-2), \
        "mismatch vs reference"

    print("KERNEL_OK")
</pallas_src>

<mosaic_0001>
module attributes {stable_mosaic.version = 11 : i64} {
  func.func @_attention_block_kernel(%arg0: i32, %arg1: i32, %arg2: memref<1x4x256xbf16, #tpu.memory_space<vmem>>, %arg3: memref<1x4x256xbf16, #tpu.memory_space<vmem>>, %arg4: memref<8x4xbf16, #tpu.memory_space<vmem>>, %arg5: memref<8x4xbf16, #tpu.memory_space<vmem>>, %arg6: memref<8x1xf32, #tpu.memory_space<vmem>>, %arg7: memref<8x1xf32, #tpu.memory_space<vmem>>, %arg8: memref<1x1xf32, #tpu.memory_space<vmem>>, %arg9: memref<1x4x256xbf16, #tpu.memory_space<vmem>>) attributes {dimension_semantics = [#tpu.dimension_semantics<parallel>, #tpu.dimension_semantics<parallel>], iteration_bounds = array<i64: 2, 1>, scalar_prefetch = 0 : i64, scratch_operands = 0 : i64, tpu.core_type = #tpu.core_type<tc>, window_params = [{transform_indices = @transform_0, window_bounds = array<i64: 1, 4, 256>}, {transform_indices = @transform_1, window_bounds = array<i64: 1, 4, 256>}, {pipeline_mode = #tpu.pipeline_mode<synchronous>, transform_indices = @transform_2, window_bounds = array<i64: 8, 4>}, {pipeline_mode = #tpu.pipeline_mode<synchronous>, transform_indices = @transform_3, window_bounds = array<i64: 8, 4>}, {pipeline_mode = #tpu.pipeline_mode<synchronous>, transform_indices = @transform_4, window_bounds = array<i64: 8, 1>}, {pipeline_mode = #tpu.pipeline_mode<synchronous>, transform_indices = @transform_5, window_bounds = array<i64: 8, 1>}, {pipeline_mode = #tpu.pipeline_mode<synchronous>, transform_indices = @transform_6, window_bounds = array<i64: 1, 1>}, {transform_indices = @transform_7, window_bounds = array<i64: 1, 4, 256>}]} {
    %c0 = arith.constant 0 : index
    %c0_0 = arith.constant 0 : index
    %0 = vector.load %arg4[%c0, %c0_0] : memref<8x4xbf16, #tpu.memory_space<vmem>>, vector<8x4xbf16>
    %c0_1 = arith.constant 0 : index
    %c0_2 = arith.constant 0 : index
    %c0_3 = arith.constant 0 : index
    %1 = vector.load %arg2[%c0_1, %c0_2, %c0_3] : memref<1x4x256xbf16, #tpu.memory_space<vmem>>, vector<1x4x256xbf16>
    %2 = vector.shape_cast %1 : vector<1x4x256xbf16> to vector<4x256xbf16>
    %cst = arith.constant dense<0.000000e+00> : vector<8x256xf32>
    %3 = tpu.matmul %0, %2, %cst {dimension_numbers = #tpu.dot_dimension_numbers<[1], [0], [0], [1], [0, 0, 1, 1], [], []>} : vector<8x4xbf16>, vector<4x256xbf16>, vector<8x256xf32> -> vector<8x256xf32>
    %c0_4 = arith.constant 0 : index
    %c0_5 = arith.constant 0 : index
    %4 = vector.load %arg5[%c0_4, %c0_5] : memref<8x4xbf16, #tpu.memory_space<vmem>>, vector<8x4xbf16>
    %c0_6 = arith.constant 0 : index
    %c0_7 = arith.constant 0 : index
    %c0_8 = arith.constant 0 : index
    %5 = vector.load %arg3[%c0_6, %c0_7, %c0_8] : memref<1x4x256xbf16, #tpu.memory_space<vmem>>, vector<1x4x256xbf16>
    %6 = vector.shape_cast %5 : vector<1x4x256xbf16> to vector<4x256xbf16>
    %cst_9 = arith.constant dense<0.000000e+00> : vector<8x256xf32>
    %7 = tpu.matmul %4, %6, %cst_9 {dimension_numbers = #tpu.dot_dimension_numbers<[1], [0], [0], [1], [0, 0, 1, 1], [], []>} : vector<8x4xbf16>, vector<4x256xbf16>, vector<8x256xf32> -> vector<8x256xf32>
    %8 = arith.addf %3, %7 : vector<8x256xf32>
    %c0_10 = arith.constant 0 : index
    %c0_11 = arith.constant 0 : index
    %9 = vector.load %arg6[%c0_10, %c0_11] : memref<8x1xf32, #tpu.memory_space<vmem>>, vector<8x1xf32>
    %10 = vector.broadcast %9 : vector<8x1xf32> to vector<8x256xf32>
    %11 = arith.addf %8, %10 : vector<8x256xf32>
    %cst_12 = arith.constant 0.000000e+00 : f32
    %12 = vector.broadcast %cst_12 : f32 to vector<8x256xf32>
    %13 = arith.cmpf oge, %11, %12 : vector<8x256xf32>
    %cst_13 = arith.constant 0.00999999977 : f32
    %14 = vector.broadcast %cst_13 : f32 to vector<8x256xf32>
    %15 = arith.mulf %14, %11 : vector<8x256xf32>
    %16 = arith.select %13, %11, %15 : vector<8x256xi1>, vector<8x256xf32>
    %c0_14 = arith.constant 0 : index
    %c0_15 = arith.constant 0 : index
    %17 = vector.load %arg7[%c0_14, %c0_15] : memref<8x1xf32, #tpu.memory_space<vmem>>, vector<8x1xf32>
    %18 = vector.broadcast %17 : vector<8x1xf32> to vector<8x256xf32>
    %19 = arith.mulf %16, %18 : vector<8x256xf32>
    %cst_16 = arith.constant dense<0.000000e+00> : vector<256xf32>
    %20 = vector.multi_reduction <add>, %19, %cst_16 [0] : vector<8x256xf32> to vector<256xf32>
    %21 = vector.shape_cast %20 : vector<256xf32> to vector<1x256xf32>
    %c0_17 = arith.constant 0 : index
    %c0_18 = arith.constant 0 : index
    %22 = vector.load %arg8[%c0_17, %c0_18] : memref<1x1xf32, #tpu.memory_space<vmem>>, vector<1x1xf32>
    %23 = vector.broadcast %22 : vector<1x1xf32> to vector<1x256xf32>
    %24 = arith.addf %21, %23 : vector<1x256xf32>
    %25 = arith.negf %24 : vector<1x256xf32>
    %26 = math.exp %25 : vector<1x256xf32>
    %cst_19 = arith.constant 1.000000e+00 : f32
    %27 = vector.broadcast %cst_19 : f32 to vector<1x256xf32>
    %28 = arith.addf %27, %26 : vector<1x256xf32>
    %29 = arith.divf %27, %28 : vector<1x256xf32>
    %30 = arith.truncf %29 : vector<1x256xf32> to vector<1x256xbf16>
    %c0_20 = arith.constant 0 : index
    %c0_21 = arith.constant 0 : index
    %c0_22 = arith.constant 0 : index
    %31 = vector.load %arg3[%c0_20, %c0_21, %c0_22] : memref<1x4x256xbf16, #tpu.memory_space<vmem>>, vector<1x4x256xbf16>
    %32 = vector.shape_cast %31 : vector<1x4x256xbf16> to vector<4x256xbf16>
    %33 = vector.broadcast %30 : vector<1x256xbf16> to vector<4x256xbf16>
    %34 = arith.mulf %32, %33 : vector<4x256xbf16>
    %c0_23 = arith.constant 0 : index
    %c0_24 = arith.constant 0 : index
    %c0_25 = arith.constant 0 : index
    %35 = vector.load %arg9[%c0_23, %c0_24, %c0_25] : memref<1x4x256xbf16, #tpu.memory_space<vmem>>, vector<1x4x256xbf16>
    %36 = vector.shape_cast %35 : vector<1x4x256xbf16> to vector<4x256xbf16>
    %37 = vector.shape_cast %34 : vector<4x256xbf16> to vector<1x4x256xbf16>
    tpu.vector_store %arg9[%c0_23, %c0_24, %c0_25], %37 {strides = array<i32>} : memref<1x4x256xbf16, #tpu.memory_space<vmem>>, vector<1x4x256xbf16>,
    return
  }
  func.func @transform_0(%arg0: i32, %arg1: i32) -> (i32, i32, i32) {
    %c0_i32 = arith.constant 0 : i32
    %c0_i32_0 = arith.constant 0 : i32
    return %arg0, %c0_i32, %arg1 : i32, i32, i32
  }
  func.func @transform_1(%arg0: i32, %arg1: i32) -> (i32, i32, i32) {
    %c0_i32 = arith.constant 0 : i32
    %c0_i32_0 = arith.constant 0 : i32
    return %arg0, %c0_i32, %arg1 : i32, i32, i32
  }
  func.func @transform_2(%arg0: i32, %arg1: i32) -> (i32, i32) {
    %c0_i32 = arith.constant 0 : i32
    %c0_i32_0 = arith.constant 0 : i32
    %c0_i32_1 = arith.constant 0 : i32
    return %c0_i32, %c0_i32_0 : i32, i32
  }
  func.func @transform_3(%arg0: i32, %arg1: i32) -> (i32, i32) {
    %c0_i32 = arith.constant 0 : i32
    %c0_i32_0 = arith.constant 0 : i32
    %c0_i32_1 = arith.constant 0 : i32
    return %c0_i32, %c0_i32_0 : i32, i32
  }
  func.func @transform_4(%arg0: i32, %arg1: i32) -> (i32, i32) {
    %c0_i32 = arith.constant 0 : i32
    %c0_i32_0 = arith.constant 0 : i32
    %c0_i32_1 = arith.constant 0 : i32
    return %c0_i32, %c0_i32_0 : i32, i32
  }
  func.func @transform_5(%arg0: i32, %arg1: i32) -> (i32, i32) {
    %c0_i32 = arith.constant 0 : i32
    %c0_i32_0 = arith.constant 0 : i32
    %c0_i32_1 = arith.constant 0 : i32
    return %c0_i32, %c0_i32_0 : i32, i32
  }
  func.func @transform_6(%arg0: i32, %arg1: i32) -> (i32, i32) {
    %c0_i32 = arith.constant 0 : i32
    %c0_i32_0 = arith.constant 0 : i32
    %c0_i32_1 = arith.constant 0 : i32
    return %c0_i32, %c0_i32_0 : i32, i32
  }
  func.func @transform_7(%arg0: i32, %arg1: i32) -> (i32, i32, i32) {
    %c0_i32 = arith.constant 0 : i32
    %c0_i32_0 = arith.constant 0 : i32
    return %arg0, %c0_i32, %arg1 : i32, i32, i32
  }
}

</mosaic_0001>

<bundles_post_ra>
// kernel: tpu_custom_call.1
= control target key start
LH: loop header
LB: loop body
LE: loop exit
PB: predicated region body
PF: predicated region fallthrough
CT: control target
= control target key end

     0   :  { %s1017_s0 = inlined_call_operand.vmem [shape: bf16[2,4,256], index: 0, kind: input, shape index: {}]   ;;  %s1018_s1 = inlined_call_operand.vmem [shape: bf16[2,4,256], index: 1, kind: input, shape index: {}]   ;;  %s1019_s2 = inlined_call_operand.vmem [shape: bf16[8,4], index: 2, kind: input, shape index: {}]   ;;  %s1020_s3 = inlined_call_operand.vmem [shape: bf16[8,4], index: 3, kind: input, shape index: {}]   ;;  %s1021_s4 = inlined_call_operand.vmem [shape: f32[8,1], index: 4, kind: input, shape index: {}]   ;;  %s1022_s5 = inlined_call_operand.vmem [shape: f32[8,1], index: 5, kind: input, shape index: {}]   ;;  %s1023_s6 = inlined_call_operand.<no memory space> [shape: f32[1,1], index: 6, kind: input, shape index: {}]   ;;  %s1024_s7 = inlined_call_operand.hbm [shape: bf16[2,4,256], index: 7, kind: output, shape index: {}]  }
   0x1   :  { %v12_v0 = vstv %s1023_s6 }
   0x2   :  { %13 = vst [vmem:[#allocation2] sm:$0x1] %v12_v0 }
   0x3   :  { %14 = vsyncpa [#allocation4], 0 }
   0x4   :  { %16 = vsyncpa [#allocation4 + $0x1], 0  ;;  %s874_s26 = smov 0   ;;  %s876_s27 = smov 0  }
   0x5   :  { %s878_s28 = smov 0   ;;  %s880_s29 = smov 0  }
   0x6   :  { %s882_s30 = smov 0   ;;  %s884_s8 = smov 0  }
   0x7 LB: > { %s655_s6 = sadd.s32 4294967295, %s826_s8   ;;  %s656_s9 = sadd.s32 4294967294, %s826_s8   ;;  %s826_s8 = sphi %s884_s8, %s22_s8   ;;  %s822_s30 = sphi %s882_s30, %s1031_s30   ;;  %s818_s29 = sphi %s880_s29, %s1030_s29   ;;  %s814_s28 = sphi %s878_s28, %s1029_s28   ;;  %s810_s27 = sphi %s876_s27, %s1028_s27   ;;  %s806_s26 = sphi %s874_s26, %s1027_s26  }
   0x8   : > { %s34_s10 = sadd.s32 1, %s822_s30  ;;  %s204_s11 = sadd.s32 1, %s814_s28 }
   0x9   : > { %p36_p0 = scmp.ge.s32.totalorder %s34_s10, 2  ;;  %p214_p1 = scmp.ne.s32.totalorder %s814_s28, %s810_s27 }
   0xa   : > { %p215_p2 = scmp.eq.s32.totalorder %s655_s6, 1  ;;  %p220_p3 = scmp.ne.s32.totalorder %s810_s27, %s806_s26 }
   0xb   : > { %s1033_s10 = smov (%p36_p0, %s34_s10), 0  ;;  %p221_p5 = scmp.eq.s32.totalorder %s656_s9, 1 }
   0xc   : > { %p914_p4 = por %p215_p2, %p214_p1  ;;  %s199_s13 = ssub.s32 %s822_s30, %s1033_s10 }
   0xd   : > { %p659_p6 = scmp.ge.s32.totalorder %s826_s8, 1  ;;  %p202_p7 = scmp.eq.s32.totalorder %s199_s13, 0 }
   0xe   : > { %p921_p8 = por %p221_p5, %p220_p3  ;;  %p280_p9 = scmp.lt.s32.totalorder %s826_s8, 3 }
   0xf   : > { %s927_s15 = scalar_select %p202_p7, %s814_s28, %s204_s11  }
  0x10   : > { %p281_p10 = pnand %p659_p6, %p280_p9 }
  0x11   : > { %p326_p11 = scmp.lt.s32.totalorder (!%p281_p10), %s818_s29, 1  ;;  %v355_v1 = vlaneseq (!%p281_p10)  ;;  %v471_v2 = vld [vmem:[%s1021_s4] sm:$0xff] (!%p281_p10)  ;;  %v828_v3 = vmov (!%p281_p10), 1983009808   ;;  %v829_v5 = vmov (!%p281_p10), 0   ;;  %vm364_vm0 = vcmask (!%p281_p10), 1041408  }
  0x12   : > { %284 = sbr.rel (%p281_p10) target bundleno = 321 (0x141), region = 48  ;;  %v353_v4 = vunpack.c.l.s4 (!%p281_p10), %v828_v3  ;;  %462 = vmatprep.mubr.bf16.mxu1 (!%p281_p10), %v829_v5  ;;  %403 = vmatprep.mubr.bf16.mxu0 (!%p281_p10), %v829_v5  ;;  %v505_v7 = vld [vmem:[#allocation2] sm:$0x1] (!%p281_p10)  ;;  %vm360_vm1 = vcmask (!%p281_p10), 31744   ;;  %s680_s20 = sshll.u32 (!%p281_p10), %s818_s29, 6 }
  0x13   : > { %v934_v6 = vshrl.u32 (!%p281_p10), %v355_v1, 7  ;;  %738 = vset.pattern.permute.xlu0 (!%p281_p10), %v829_v5  ;;  %739 = vset.pattern.permute.xlu1 (!%p281_p10), %v829_v5  ;;  %v485_v9 = vld [vmem:[%s1022_s5] sm:$0xff] (!%p281_p10)  ;;  %s970_s25 = scalar_lea.hbm (!%p281_p10), %s1024_s7, %s680_s20 }
  0x14   : > { %v354_v8 = vunpack.c.0.s8 (!%p281_p10), %v353_v4  ;;  %474 = vperm.xlu0 (!%p281_p10), %738, %v471_v2   ;;  %508 = vperm.xlu1 (!%p281_p10), %739, %v505_v7   ;;  %v347_v18 = vld [vmem:[%s1019_s2] sm:$0xf] (!%p281_p10) }
  0x15   : > { %v349_v19 = vld [vmem:[%s1020_s3] sm:$0xf] (!%p281_p10)  ;;  %v513_v45 = vsub.s32 (!%p281_p10), 0, %v934_v6 }
  0x16   : > { %v946_v10 = vsub.s32 (!%p281_p10), %v354_v8, %v934_v6 }
  0x18   : > { %488 = vperm.xlu0 (!%p281_p10), %738, %v485_v9  }
  0x19   : > { %s327_s18 = scalar_select %p326_p11, %s818_s29, 1 }
  0x1a   : > { %s830_s29 = smov [#allocation3]  }
  0x1b   : > { %s678_s19 = sshll.u32 %s327_s18, 2  ;;  %s322_s18 = sand.u32 1, %s810_s27  }
  0x1c   : > { %s333_s24 = scalar_lea.vmem %s1017_s0, %s678_s19  ;;  %s343_s9 = scalar_lea.vmem %s1018_s1, %s678_s19 }
  0x1d   : > { %v667_v11 = vld.sshfl [vmem:[%s333_s24] sm:$0x33 pattern:$0x76325410]  ;;  %s660_s19 = sshll.u32 %s322_s18, 2  ;;  %s545_s6 = scalar_lea.sflag [#allocation4], %s322_s18 }
  0x1e   : > { %v948_v12 = vld [vmem:[%s343_s9] sm:$0xf]  ;;  %v420_v13 = vcombine.high %v667_v11, %v667_v11  ;;  %v425_v14 = vsel %vm364_vm0, %v667_v11, 0  ;;  %s324_s21 = scalar_lea.vmem [#allocation3], %s660_s19  ;;  %s752_s11 = sshll.u32 %s830_s29, 4  ;;  %s753_s11 = int_to_ptr.vmem [resolvable:$false] %s752_s11 }
  0x1f   : > { %v358_v15 = vrot.slane %v948_v12, %v946_v10  ;;  %s561_s22 = sshll.u32 %s324_s21, 4  ;;  %s754_s13 = scalar_lea.vmem %s753_s11, 128  ;;  %s972_s22 = int_to_ptr.vmem [resolvable:$true] %s561_s22 }
  0x20   : > { %668 = vmatprep.subr.msk.bf16.mxu1 %vm364_vm0, %v420_v13  ;;  %s748_s9 = scalar_lea.vmem %s972_s22, 64  ;;  %p755_p1 = scmp.lt.s32.totalorder %s972_s22, %s753_s11 }
  0x21   : > { %v359_v16 = vcombine.high %v358_v15, %v358_v15  ;;  %v366_v17 = vsel %vm364_vm0, %v358_v15, 0  ;;  %431 = vmatpush1.bf16.msra.mxu1 %v425_v14  ;;  %p749_p12 = scmp.ne.s32.totalorder %s972_s22, %s748_s9  ;;  %p756_p2 = scmp.lt.s32.totalorder %s754_s13, %s748_s9 }
  0x23   : > { %665 = vmatprep.subr.msk.bf16.mxu0 %vm364_vm0, %v359_v16  ;;  %p750_p13 = pnand %p749_p12, %p914_p4  ;;  %p757_p3 = por %p756_p2, %p755_p1 }
  0x24   : > { %372 = vmatpush1.bf16.msra.mxu0 %v366_v17  ;;  %669 = vmatmul.mubr.msk.bf16.vlgmr.msra.gmra.mrb[0].mxu1 %vm360_vm1, %v347_v18 }
  0x25   : > { %p751_p0 = pneg %p750_p13 }
  0x27   : > { %666 = vmatmul.mubr.msk.bf16.vlgmr.msra.gmra.mrb[0].mxu0 %vm360_vm1, %v349_v19  ;;  %p758_p5 = pnand %p757_p3, %p751_p0 }
  0x93   : > { %v475_v21 = vpop.permute.xlu0 %474  ;;  %v509_v47 = vpop.permute.xlu1 %508 }
  0x94   : > { %v514_v51 = vrot.slane %v509_v47, %v513_v45 }
  0x97   : > { %v489_v35 = vpop.permute.xlu0 %488 }
  0xf7   : > { %v464_v20 = vpop.f32.mrb[0].mxu1 }
  0xf8   : > { %v466_v22 = vpop.f32.mrb[1].mxu1 }
  0xf9   : > { %v468_v24 = vpop.f32.mrb[2].mxu1 }
  0xfa   : > { %v405_v23 = vpop.f32.mrb[0].mxu0  ;;  %v469_v27 = vpop.f32.mrb[3].mxu1 }
  0xfb   : > { %v465_v25 = vadd.f32 %v464_v20, %v405_v23  ;;  %v407_v26 = vpop.f32.mrb[1].mxu0 }
  0xfc   : > { %v467_v28 = vadd.f32 %v466_v22, %v407_v26  ;;  %v409_v29 = vpop.f32.mrb[2].mxu0 }
  0xfd   : > { %v477_v30 = vadd.f32 %v475_v21, %v465_v25  ;;  %v410_v31 = vpop.f32.mrb[3].mxu0 }
  0xfe   : > { %v478_v32 = vadd.f32 %v475_v21, %v467_v28 }
  0xff   : > { %vm479_vm2 = vcmp.ge.f32.partialorder %v477_v30, 0.0  ;;  %v481_v33 = vmul.f32 0.01, %v477_v30 }
 0x100   : > { %vm480_vm3 = vcmp.ge.f32.partialorder %v478_v32, 0.0  ;;  %v482_v34 = vmul.f32 0.01, %v478_v32 }
 0x101   : > { %v483_v36 = vsel %vm479_vm2, %v477_v30, %v481_v33 }
 0x102   : > { %v484_v37 = vsel %vm480_vm3, %v478_v32, %v482_v34  ;;  %v491_v38 = vmul.f32 %v489_v35, %v483_v36 }
 0x103   : > { %v492_v39 = vmul.f32 %v489_v35, %v484_v37 }
 0x104   : > { %v493_v40 = vrot.slane %v491_v38, 4 }
 0x105   : > { %v499_v41 = vrot.slane %v492_v39, 4 }
 0x106   : > { %v494_v42 = vadd.f32 %v493_v40, %v491_v38 }
 0x107   : > { %v500_v43 = vadd.f32 %v499_v41, %v492_v39 }
 0x108   : > { %v495_v44 = vrot.slane %v494_v42, 2 }
 0x109   : > { %v501_v46 = vrot.slane %v500_v43, 2 }
 0x10a   : > { %v496_v48 = vadd.f32 %v495_v44, %v494_v42 }
 0x10b   : > { %v502_v49 = vadd.f32 %v501_v46, %v500_v43 }
 0x10c   : > { %v497_v50 = vrot.slane %v496_v48, 1 }
 0x10d   : > { %v503_v52 = vrot.slane %v502_v49, 1 }
 0x10e   : > { %v498_v53 = vadd.f32 %v497_v50, %v496_v48 }
 0x10f   : > { %v504_v54 = vadd.f32 %v503_v52, %v502_v49 }
 0x110   : > { %v515_v55 = vadd.f32 %v514_v51, %v498_v53 }
 0x111   : > { %v516_v56 = vadd.f32 %v514_v51, %v504_v54 }
 0x112   : > { %v670_v57 = vmul.f32 -1.442695, %v515_v55 }
 0x113   : > { %v671_v58 = vmul.f32 -1.442695, %v516_v56 }
 0x114   : > { %740 = vpow2.f32 %v670_v57 }
 0x115   : > { %742 = vpow2.f32 %v671_v58 }
 0x11e   : > { %v741_v59 = vpop.eup %740 }
 0x11f   : > { %v743_v60 = vpop.eup %742  ;;  %v523_v61 = vadd.f32 1.0, %v741_v59 }
 0x120   : > { %v524_v62 = vadd.f32 1.0, %v743_v60 }
 0x121   : > { %744 = vrcp.f32 %v523_v61 }
 0x122   : > { %746 = vrcp.f32 %v524_v62 }
 0x12b   : > { %v745_v63 = vpop.eup %744 }
 0x12c   : > { %v747_v0 = vpop.eup %746 }
 0x12d   : > { %v672_v1 = vpack.c.bf16 %v747_v0, %v745_v63 }
 0x12f   : > { %v540_v2 = vrot.slane %v672_v1, %v946_v10 }
 0x131   : > { %v542_v3 = vmul.bf16 %v540_v2, %v948_v12 }
 0x133   : > { %543 = vst [vmem:[%s324_s21] sm:$0xf] %v542_v3 }
 0x134   : > { %761 = shalt.err (!%p758_p5)
}
 0x135   : > { %s762_s16 = scalar_lea.hbm %s970_s25, 64  ;;  %s766_s19 = scalar_lea.hbm %s1024_s7, 128 }
 0x136   : > { %p763_p6 = scmp.ne.s32.totalorder %s970_s25, %s762_s16  ;;  %p767_p10 = scmp.lt.u32.totalorder %s970_s25, %s1024_s7 }
 0x137   : > { %p768_p11 = scmp.lt.u32.totalorder %s766_s19, %s762_s16  ;;  %p770_p13 = scmp.lt.u32.totalorder %s762_s16, %s970_s25 }
 0x138   : > { %p764_p7 = pnand %p763_p6, %p914_p4 }
 0x139   : > { %p769_p12 = por %p768_p11, %p767_p10 }
 0x13a   : > { %p765_p9 = pneg %p764_p7 }
 0x13b   : > { %p771_p0 = por %p770_p13, %p769_p12 }
 0x13d   : > { %p772_p1 = pnand %p771_p0, %p765_p9 }
 0x13f   : > { %775 = shalt.err (!%p772_p1)
}
 0x140   : > { %681 = dma.vmem_to_hbm [thread:$0]  (%p914_p4), %s972_s22, 64, %s970_s25, %s545_s6  }
 0x141 PF: > { %p687_p2 = scmp.ge.s32.totalorder %s826_s8, 2  ;;  %s573_s23 = sand.u32 1, %s806_s26  }
 0x142   : > { %s574_s24 = scalar_lea.sflag [#allocation4], %s573_s23 }
 0x143   : > { %p684_p3 = pnand %p687_p2, %p921_p8 }
 0x145   : > { %801 = dma.done.wait (!%p684_p3), %s574_s24, 64  }
 0x146   : > { %803 = vsyncadd (!%p684_p3), %s574_s24, 4294967232  ;;  %s22_s8 = sadd.s32 1, %s826_s8   ;;  %s1027_s26 = smov %s810_s27 }
 0x147   : > { %p19_p5 = scmp.ge.s32.totalorder %s22_s8, 4   ;;  %s1028_s27 = smov %s814_s28 }
 0x148   : > { %s1029_s28 = smov %s927_s15  ;;  %s1030_s29 = smov %s822_s30 }
 0x149   : > { %s1031_s30 = smov %s1033_s10  ;;  %21 = sbr.rel (!%p19_p5) target bundleno = 7 (0x7), region = 86 }
 0x150   :  { %579 = vsyncpa [#allocation4], 1 }
 0x151   :  { %581 = vsyncpa [#allocation4 + $0x1], 1 }

</bundles_post_ra>
